<compile_context>
chip_gen: v6e
topology: v6e:2x2x1
jax: 0.10.0
libtpu: 0.0.40
codegen_flags: <defaults>
</compile_context>

<pallas_src>
import jax
import jax.numpy as jnp
from jax.experimental import pallas as pl
from jax.experimental.pallas import tpu as pltpu

_LANE = 128     # vreg lane width
_SUBLANE = 8    # vreg sublane depth (f32)


def fused_linear_kernel(x_ref, wt_ref, o_ref):
    # x_ref: (B_pad, F_pad), wt_ref: (F_pad, F_pad) in (in, out) layout,
    # o_ref: (B_pad, F_pad). Single lane-dense MXU pass, f32 accumulation.
    o_ref[...] = jnp.dot(
        x_ref[...], wt_ref[...], preferred_element_type=jnp.float32
    ).astype(o_ref.dtype)


def _round_up(n, m):
    return ((n + m - 1) // m) * m


def replica_model_forward(x, w1, w2):
    """Pallas equivalent of ReplicaModel(layer_count=2, _with_bias=False).forward.

    forward(x) = sum([seq(x)]) = (x @ W1^T) @ W2^T = x @ (W2 @ W1)^T
    The fold + transpose is free wrapper-side layout plumbing; the kernel runs a
    single lane-dense matmul on the MXU.
    """
    B, F = x.shape
    # Fold the two layers and pre-transpose to (in_features, out_features).
    wt = (w2 @ w1).T                                  # (F, F)

    # Zero-pad to sublane/lane-aligned tiles. Padding cannot perturb valid outputs:
    # the extra K rows of wt are zero, and extra output rows/cols are sliced off.
    B_pad = _round_up(B, _SUBLANE)
    F_pad = _round_up(F, _LANE)
    x_p = jnp.zeros((B_pad, F_pad), x.dtype).at[:B, :F].set(x)
    wt_p = jnp.zeros((F_pad, F_pad), wt.dtype).at[:F, :F].set(wt)

    out_p = pl.pallas_call(
        fused_linear_kernel,
        out_shape=jax.ShapeDtypeStruct((B_pad, F_pad), x.dtype),
        # Gridless call: whole (tiny) operands resident in VMEM, kernel runs once.
        in_specs=[
            pl.BlockSpec(memory_space=pltpu.MemorySpace.VMEM),
            pl.BlockSpec(memory_space=pltpu.MemorySpace.VMEM),
        ],
        out_specs=pl.BlockSpec(memory_space=pltpu.MemorySpace.VMEM),
    )(x_p, wt_p)

    return out_p[:B, :F]


def reference_forward(x, w1, w2):
    # Pure-JAX reference of the unfused module: sum([seq(x)]) == (x @ W1.T) @ W2.T
    return (x @ w1.T) @ w2.T


if __name__ == "__main__":
    key = jax.random.PRNGKey(0)
    kx, k1, k2 = jax.random.split(key, 3)

    batch, feat = 8, 10  # nn.Linear(10, 10)

    # Deterministic parameter init, mimicking PyTorch's U(-1/sqrt(fan_in), 1/sqrt(fan_in)).
    bound = 1.0 / jnp.sqrt(jnp.float32(feat))
    w1 = jax.random.uniform(k1, (feat, feat), jnp.float32, -bound, bound)
    w2 = jax.random.uniform(k2, (feat, feat), jnp.float32, -bound, bound)
    x = jax.random.normal(kx, (batch, feat), jnp.float32)

    out = jax.jit(replica_model_forward)(x, w1, w2)
    out = jax.block_until_ready(out)

    ref = reference_forward(x, w1, w2)
    assert out.shape == (batch, feat)
    assert jnp.allclose(out, ref, atol=1e-5, rtol=1e-5), "mismatch vs reference"

    print("KERNEL_OK")
</pallas_src>

<mosaic_0001>
module attributes {stable_mosaic.version = 11 : i64} {
  func.func @fused_linear_kernel(%arg0: memref<8x128xf32, #tpu.memory_space<vmem>>, %arg1: memref<128x128xf32, #tpu.memory_space<vmem>>, %arg2: memref<8x128xf32, #tpu.memory_space<vmem>>) attributes {dimension_semantics = [], scalar_prefetch = 0 : i64, scratch_operands = 0 : i64, tpu.core_type = #tpu.core_type<tc>} {
    %c0 = arith.constant 0 : index
    %c0_0 = arith.constant 0 : index
    %0 = vector.load %arg0[%c0, %c0_0] : memref<8x128xf32, #tpu.memory_space<vmem>>, vector<8x128xf32>
    %c0_1 = arith.constant 0 : index
    %c0_2 = arith.constant 0 : index
    %1 = vector.load %arg1[%c0_1, %c0_2] : memref<128x128xf32, #tpu.memory_space<vmem>>, vector<128x128xf32>
    %cst = arith.constant dense<0.000000e+00> : vector<8x128xf32>
    %2 = tpu.matmul %0, %1, %cst {dimension_numbers = #tpu.dot_dimension_numbers<[1], [0], [0], [1], [0, 0, 1, 1], [], []>} : vector<8x128xf32>, vector<128x128xf32>, vector<8x128xf32> -> vector<8x128xf32>
    %c0_3 = arith.constant 0 : index
    %c0_4 = arith.constant 0 : index
    %3 = vector.load %arg2[%c0_3, %c0_4] : memref<8x128xf32, #tpu.memory_space<vmem>>, vector<8x128xf32>
    tpu.vector_store %arg2[%c0_3, %c0_4], %2 {strides = array<i32>} : memref<8x128xf32, #tpu.memory_space<vmem>>, vector<8x128xf32>,
    return
  }
}

</mosaic_0001>

<bundles_post_ra>
// kernel: replica_model_forward.1
= control target key start
LH: loop header
LB: loop body
LE: loop exit
PB: predicated region body
PF: predicated region fallthrough
CT: control target
= control target key end

     0   :  { %v191_v1 = vmov 0.0   ;;  %vm192_vm0 = vmmov 0   ;;  %s263_s0 = inlined_call_operand.vmem [shape: f32[8,128], index: 0, kind: input, shape index: {}]   ;;  %s264_s1 = inlined_call_operand.vmem [shape: f32[128,128], index: 1, kind: input, shape index: {}]   ;;  %s265_s2 = inlined_call_operand.hbm [shape: f32[8,128], index: 2, kind: output, shape index: {}]  }
   0x1   :  { %v28_v0 = vld [vmem:[%s264_s1 + $0x78] sm:$0xff]  ;;  %131 = vmatprep.subr.mxu0 %v191_v1  ;;  %v27_v2 = vld [vmem:[%s264_s1 + $0x70] sm:$0xff]  ;;  %163 = vmatprep.mubr.msk.f32.mxu0 %vm192_vm0, %v191_v1  ;;  %v26_v3 = vld [vmem:[%s264_s1 + $0x68] sm:$0xff] }
   0x2   :  { %132 = vmatpush3.msra.mxu0 %v28_v0  ;;  %v25_v4 = vld [vmem:[%s264_s1 + $0x60] sm:$0xff] }
   0x3   :  { %133 = vmatprep.subr.mxu0 %v191_v1 }
   0x4   :  { %134 = vmatpush3.msra.mxu0 %v27_v2 }
   0x5   :  { %135 = vmatprep.subr.mxu0 %v191_v1 }
   0x6   :  { %7 = vsyncpa [#allocation3], 0  ;;  %136 = vmatpush3.msra.mxu0 %v26_v3  ;;  %v24_v5 = vld [vmem:[%s264_s1 + $0x58] sm:$0xff]  ;;  %v23_v6 = vld [vmem:[%s264_s1 + $0x50] sm:$0xff]  ;;  %s193_s15 = smov [#allocation2]  }
   0x7   :  { %137 = vmatprep.subr.mxu0 %v191_v1  ;;  %v22_v7 = vld [vmem:[%s264_s1 + $0x48] sm:$0xff]  ;;  %v21_v8 = vld [vmem:[%s264_s1 + $0x40] sm:$0xff]  ;;  %v20_v9 = vld [vmem:[%s264_s1 + $0x38] sm:$0xff]  ;;  %s106_s16 = sshll.u32 %s193_s15, 4  ;;  %s107_s16 = int_to_ptr.vmem [resolvable:$true] %s106_s16 }
   0x8   :  { %138 = vmatpush3.msra.mxu0 %v25_v4  ;;  %v19_v10 = vld [vmem:[%s264_s1 + $0x30] sm:$0xff]  ;;  %v18_v11 = vld [vmem:[%s264_s1 + $0x28] sm:$0xff]  ;;  %v17_v12 = vld [vmem:[%s264_s1 + $0x20] sm:$0xff]  ;;  %s169_s17 = scalar_lea.vmem %s107_s16, 128  ;;  %p174_p1 = scmp.lt.s32.totalorder %s107_s16, %s107_s16 }
   0x9   :  { %139 = vmatprep.subr.mxu0 %v191_v1  ;;  %v16_v13 = vld [vmem:[%s264_s1 + $0x18] sm:$0xff]  ;;  %v15_v14 = vld [vmem:[%s264_s1 + $0x10] sm:$0xff]  ;;  %v14_v15 = vld [vmem:[%s264_s1 + $0x8] sm:$0xff]  ;;  %p170_p0 = scmp.ne.s32.totalorder %s107_s16, %s169_s17  ;;  %p175_p2 = scmp.lt.s32.totalorder %s169_s17, %s169_s17 }
   0xa   :  { %140 = vmatpush3.msra.mxu0 %v24_v5  ;;  %v13_v16 = vld [vmem:[%s264_s1] sm:$0xff] }
   0xb   :  { %141 = vmatprep.subr.mxu0 %v191_v1  ;;  %v12_v17 = vld [vmem:[%s263_s0] sm:$0xff]  ;;  %p176_p3 = por %p175_p2, %p174_p1 }
   0xc   :  { %142 = vmatpush3.msra.mxu0 %v23_v6 }
   0xd   :  { %143 = vmatprep.subr.mxu0 %v191_v1  ;;  %p177_p4 = pnand %p176_p3, %p170_p0 }
   0xe   :  { %144 = vmatpush3.msra.mxu0 %v22_v7 }
   0xf   :  { %145 = vmatprep.subr.mxu0 %v191_v1 }
  0x10   :  { %146 = vmatpush3.msra.mxu0 %v21_v8 }
  0x11   :  { %147 = vmatprep.subr.mxu0 %v191_v1 }
  0x12   :  { %148 = vmatpush3.msra.mxu0 %v20_v9 }
  0x13   :  { %149 = vmatprep.subr.mxu0 %v191_v1 }
  0x14   :  { %150 = vmatpush3.msra.mxu0 %v19_v10 }
  0x15   :  { %151 = vmatprep.subr.mxu0 %v191_v1 }
  0x16   :  { %152 = vmatpush3.msra.mxu0 %v18_v11 }
  0x17   :  { %153 = vmatprep.subr.mxu0 %v191_v1 }
  0x18   :  { %154 = vmatpush3.msra.mxu0 %v17_v12 }
  0x19   :  { %155 = vmatprep.subr.mxu0 %v191_v1 }
  0x1a   :  { %156 = vmatpush3.msra.mxu0 %v16_v13 }
  0x1b   :  { %157 = vmatprep.subr.mxu0 %v191_v1 }
  0x1c   :  { %158 = vmatpush3.msra.mxu0 %v15_v14 }
  0x1d   :  { %159 = vmatprep.subr.mxu0 %v191_v1 }
  0x1e   :  { %160 = vmatpush3.msra.mxu0 %v14_v15 }
  0x1f   :  { %161 = vmatprep.subr.mxu0 %v191_v1 }
  0x20   :  { %162 = vmatpush3.msra.mxu0 %v13_v16 }
  0x21   :  { %164 = vmatmul.mubr.f32.vlgmr.msra.gmra.mxu0 %v12_v17 }
  0xe1   :  { %v95_v18 = vpop.f32.mrf.mxu0 }
  0xe2   :  { %99 = vst [vmem:[#allocation2] sm:$0xff] %v95_v18 }
  0xe3   :  { %v165_v19 = vpop.f32.mrf.mxu0 }
  0xe4   :  { %180 = shalt.err (!%p177_p4)
}
  0xe5   :  { %109 = dma.vmem_to_hbm [thread:$0]  %s107_s16, 128, %s265_s2, [#allocation3]  }
  0xe6   :  { %189 = dma.done.wait [#allocation3], 128  }
  0xe7   :  { %190 = vsyncadd [#allocation3], 4294967168 }
  0xe8   :  { %113 = vsyncpa [#allocation3], 1 }

</bundles_post_ra>
